<compile_context>
chip_gen: v6e
topology: v6e:2x2x1
jax: 0.10.0
libtpu: 0.0.40
codegen_flags: <defaults>
</compile_context>

<pallas_src>
from functools import partial

import jax
import jax.numpy as jnp
from jax.experimental import pallas as pl
from jax.experimental.pallas import tpu as pltpu

DROP_PROB = 0.1
BLOCK_SIZE = 16


# --------------------------------------------------------------------------
# Phase 1: scalar scale from the (B, L) seed mask (runs once, off hot path)
# --------------------------------------------------------------------------
def _scale_kernel(u_ref, scale_ref, acc_ref, *, drop_prob, block_size,
                  total_rows, row_tile, numel):
    i = pl.program_id(0)

    @pl.when(i == 0)
    def _():
        acc_ref[...] = jnp.zeros_like(acc_ref)

    gamma = drop_prob / float(block_size ** 2)
    mask = (u_ref[...] < gamma).astype(jnp.float32)          # (tb, L)
    tb, L = mask.shape

    # Zero padding behaves exactly like max_pool's -inf padding here because
    # the mask is everywhere >= 0.
    pad = block_size // 2
    if pad > 0:
        z = jnp.zeros((tb, pad), jnp.float32)
        w = jnp.concatenate([z, mask, z], axis=1)             # (tb, L + 2*pad)
    else:
        w = mask

    # Log-time sliding max: after the loop, w[:, j] = max(padded[j : j+bs]).
    def shift_left(a, s):
        return jnp.concatenate(
            [a[:, s:], jnp.zeros((tb, s), jnp.float32)], axis=1)

    cov = 1
    while cov < block_size:                                   # 4 steps for 16
        step = min(cov, block_size - cov)
        w = jnp.maximum(w, shift_left(w, step))
        cov += step

    block_mask = 1.0 - w[:, :L]                               # (tb, L)

    # Ragged last B-tile (cdiv grid): zero out contribution of padded rows.
    row = jax.lax.broadcasted_iota(jnp.int32, (tb, 1), 0) + i * row_tile
    valid = (row < total_rows).astype(jnp.float32)
    acc_ref[...] += jnp.sum(block_mask * valid, keepdims=True)

    @pl.when(i == pl.num_programs(0) - 1)
    def _():
        # No max(sum, 1) guard: matches PyTorch exactly (inf if all dropped).
        scale_ref[...] = jnp.float32(numel) / acc_ref[...]


# --------------------------------------------------------------------------
# Phase 2: tiled, pipelined streaming multiply  o = x * scale
# --------------------------------------------------------------------------
def _scale_mul_kernel(scale_ref, x_ref, o_ref):
    # scale_ref: (1, 1) f32 in SMEM; x_ref/o_ref: (tr, tl) VMEM tiles.
    # Multiply in the input dtype (no f32 round-trip for bf16/fp8 activations).
    s = scale_ref[0, 0].astype(x_ref.dtype)
    o_ref[...] = (x_ref[...] * s).astype(o_ref.dtype)


# --------------------------------------------------------------------------
# Tiling / generation-aware tuning helpers
# --------------------------------------------------------------------------
def _chip_tuning():
    """(target phase-2 block bytes, vmem_limit_bytes), generation-aware."""
    try:
        vmem_cap = pltpu.get_tpu_info().vmem_capacity_bytes
    except Exception:
        vmem_cap = 128 * 1024 * 1024
    if vmem_cap <= 64 * 1024 * 1024:
        # v7x-class: only 64 MiB VMEM/TC but ~3.2 TB/s HBM, so bigger blocks
        # amortize the ~0.35 us/step overhead.  2 arrays x 2 buffers x 4 MiB
        # = 16 MiB of pipeline buffers, comfortably under a 48 MiB limit.
        return 4 * 1024 * 1024, 48 * 1024 * 1024
    # v5e / v6e: 2 MiB blocks already sit at ~85% of HBM roofline; 8 MiB of
    # buffers stays safe even against v5e's small scoped-VMEM default.
    return 2 * 1024 * 1024, 32 * 1024 * 1024


def _phase2_tiles(rows, length, itemsize, target_block_bytes):
    # Sub-32-bit dtypes pack along sublanes -> keep the row tile a multiple of
    # the packed-sublane group so no vreg capacity is wasted.
    sub = {1: 32, 2: 16}.get(itemsize, 8)
    # Lane tile: full extent when small (always layout-legal), else a wide
    # 128-multiple so stores stay unmasked and HBM bursts stay long.
    lane = length if length <= 2048 else 2048
    rows_budget = max(
        sub, (target_block_bytes // max(lane * itemsize, 1)) // sub * sub)
    tr = rows if rows <= rows_budget else rows_budget
    return tr, lane


def _phase1_row_tile(batch, length):
    # Keep the (tb, L) seed block around <= 4 MiB so large B*L can't blow VMEM.
    budget = max(8, ((4 * 1024 * 1024) // (4 * max(length, 1))) // 8 * 8)
    return batch if batch <= budget else budget


# --------------------------------------------------------------------------
# Wrapper
# --------------------------------------------------------------------------
def dropblock1d(x, key, *, drop_prob=DROP_PROB, block_size=BLOCK_SIZE,
                training=True):
    if (not training) or drop_prob == 0.0:
        return x

    B, C, L = x.shape

    # TODO(synk): torch.rand's CPU RNG stream cannot be reproduced bit-exactly;
    # a deterministic jax.random.uniform draw stands in for it.
    u = jax.random.uniform(key, (B, L), dtype=jnp.float32)

    # ---- phase 1: scale = numel / sum(block_mask), tiled over B ------------
    tb = _phase1_row_tile(B, L)
    nb = pl.cdiv(B, tb)
    # TODO(synk): an extremely long L (a single (tb, L) row block > VMEM) would
    # need an L-tiled halo scheme; not needed at the shapes this module sees.
    scale = pl.pallas_call(
        partial(_scale_kernel, drop_prob=drop_prob, block_size=block_size,
                total_rows=B, row_tile=tb, numel=B * L),
        out_shape=jax.ShapeDtypeStruct((1, 1), jnp.float32),
        grid=(nb,),
        in_specs=[pl.BlockSpec((tb, L), lambda i: (i, 0))],
        out_specs=pl.BlockSpec((1, 1), lambda i: (0, 0)),
        scratch_shapes=[pltpu.VMEM((1, 1), jnp.float32)],
        compiler_params=pltpu.CompilerParams(
            dimension_semantics=("arbitrary",)),
    )(u)

    # ---- phase 2: o = x * scale (HBM-bandwidth-bound streaming multiply) ---
    # Flatten (B, C, L) -> (B*C, L): free row-major reshape.  Keeps sublane
    # tiles (8,128)-aligned even for tiny C and gives both TensorCores plenty
    # of independent (row-tile x lane-tile) grid steps.
    rows = B * C
    xf = x.reshape(rows, L)
    target_bytes, vmem_limit = _chip_tuning()
    tr, tl = _phase2_tiles(rows, L, x.dtype.itemsize, target_bytes)
    grid = (pl.cdiv(rows, tr), pl.cdiv(L, tl))      # L axis fastest-varying

    out = pl.pallas_call(
        _scale_mul_kernel,
        out_shape=jax.ShapeDtypeStruct((rows, L), x.dtype),
        grid=grid,
        in_specs=[
            pl.BlockSpec(memory_space=pltpu.MemorySpace.SMEM),  # scale scalar
            pl.BlockSpec((tr, tl), lambda r, l: (r, l)),
        ],
        out_specs=pl.BlockSpec((tr, tl), lambda r, l: (r, l)),
        compiler_params=pltpu.CompilerParams(
            dimension_semantics=("parallel", "parallel"),
            vmem_limit_bytes=vmem_limit),
    )(scale, xf)
    return out.reshape(B, C, L)


# --------------------------------------------------------------------------
# Pure-JAX reference mirroring the PyTorch forward (same RNG draw u)
# --------------------------------------------------------------------------
def _reference(x, u, drop_prob=DROP_PROB, block_size=BLOCK_SIZE):
    B, C, L = x.shape
    gamma = drop_prob / float(block_size ** 2)
    mask = (u < gamma).astype(jnp.float32)
    pad = block_size // 2
    padded = jnp.pad(mask, ((0, 0), (pad, pad)))
    pooled = padded[:, 0:L]
    for d in range(1, block_size):
        pooled = jnp.maximum(pooled, padded[:, d:d + L])
    block_mask = 1.0 - pooled
    return x * (B * L) / jnp.sum(block_mask)


if __name__ == "__main__":
    key = jax.random.PRNGKey(0)
    kx, km = jax.random.split(key)

    B, C, L = 2, 4, 128
    x = jax.random.normal(kx, (B, C, L), dtype=jnp.float32)

    out = dropblock1d(x, km)
    out = jax.block_until_ready(out)

    u = jax.random.uniform(km, (B, L), dtype=jnp.float32)
    ref = _reference(x, u)
    assert out.shape == x.shape and out.dtype == x.dtype
    assert jnp.allclose(out, ref, rtol=1e-5, atol=1e-5)

    print("KERNEL_OK")
</pallas_src>

<mosaic_0001>
module attributes {stable_mosaic.version = 11 : i64} {
  func.func @_scale_kernel(%arg0: i32, %arg1: memref<2x128xf32, #tpu.memory_space<vmem>>, %arg2: memref<1x1xf32, #tpu.memory_space<vmem>>, %arg3: memref<1x1xf32, #tpu.memory_space<vmem>>) attributes {dimension_semantics = [#tpu.dimension_semantics<arbitrary>], iteration_bounds = array<i64: 1>, scalar_prefetch = 0 : i64, scratch_operands = 1 : i64, tpu.core_type = #tpu.core_type<tc>, window_params = [{transform_indices = @transform_0, window_bounds = array<i64: 2, 128>}, {pipeline_mode = #tpu.pipeline_mode<synchronous>, transform_indices = @transform_1, window_bounds = array<i64: 1, 1>}]} {
    %c0_i32 = arith.constant 0 : i32
    %0 = arith.cmpi eq, %arg0, %c0_i32 : i32
    %1 = arith.extui %0 : i1 to i32
    %c0_i32_0 = arith.constant 0 : i32
    %2 = arith.cmpi ne, %1, %c0_i32_0 : i32
    scf.if %2 {
      %cst_16 = arith.constant 0.000000e+00 : f32
      %50 = vector.broadcast %cst_16 : f32 to vector<1x1xf32>
      %c0_17 = arith.constant 0 : index
      %c0_18 = arith.constant 0 : index
      %51 = vector.load %arg3[%c0_17, %c0_18] : memref<1x1xf32, #tpu.memory_space<vmem>>, vector<1x1xf32>
      tpu.vector_store %arg3[%c0_17, %c0_18], %50 {strides = array<i32>} : memref<1x1xf32, #tpu.memory_space<vmem>>, vector<1x1xf32>,
    } else {
    }
    %c0 = arith.constant 0 : index
    %c0_1 = arith.constant 0 : index
    %3 = vector.load %arg1[%c0, %c0_1] : memref<2x128xf32, #tpu.memory_space<vmem>>, vector<2x128xf32>
    %cst = arith.constant 3.906250e-04 : f32
    %4 = vector.broadcast %cst : f32 to vector<2x128xf32>
    %5 = arith.cmpf olt, %3, %4 : vector<2x128xf32>
    %6 = arith.extui %5 : vector<2x128xi1> to vector<2x128xi32>
    %7 = arith.sitofp %6 : vector<2x128xi32> to vector<2x128xf32>
    %cst_2 = arith.constant 0.000000e+00 : f32
    %8 = vector.broadcast %cst_2 : f32 to vector<2x8xf32>
    %9 = tpu.concatenate %8, %7, %8 in 1 : vector<2x8xf32>, vector<2x128xf32>, vector<2x8xf32> -> vector<2x144xf32>
    %10 = vector.extract_strided_slice %9 {offsets = [0, 1], sizes = [2, 143], strides = [1, 1]} : vector<2x144xf32> to vector<2x143xf32>
    %cst_3 = arith.constant 0.000000e+00 : f32
    %11 = vector.broadcast %cst_3 : f32 to vector<2x1xf32>
    %12 = tpu.concatenate %10, %11 in 1 : vector<2x143xf32>, vector<2x1xf32> -> vector<2x144xf32>
    %13 = arith.maximumf %9, %12 : vector<2x144xf32>
    %14 = vector.extract_strided_slice %13 {offsets = [0, 2], sizes = [2, 142], strides = [1, 1]} : vector<2x144xf32> to vector<2x142xf32>
    %cst_4 = arith.constant 0.000000e+00 : f32
    %15 = vector.broadcast %cst_4 : f32 to vector<2x2xf32>
    %16 = tpu.concatenate %14, %15 in 1 : vector<2x142xf32>, vector<2x2xf32> -> vector<2x144xf32>
    %17 = arith.maximumf %13, %16 : vector<2x144xf32>
    %18 = vector.extract_strided_slice %17 {offsets = [0, 4], sizes = [2, 140], strides = [1, 1]} : vector<2x144xf32> to vector<2x140xf32>
    %cst_5 = arith.constant 0.000000e+00 : f32
    %19 = vector.broadcast %cst_5 : f32 to vector<2x4xf32>
    %20 = tpu.concatenate %18, %19 in 1 : vector<2x140xf32>, vector<2x4xf32> -> vector<2x144xf32>
    %21 = arith.maximumf %17, %20 : vector<2x144xf32>
    %22 = vector.extract_strided_slice %21 {offsets = [0, 8], sizes = [2, 136], strides = [1, 1]} : vector<2x144xf32> to vector<2x136xf32>
    %cst_6 = arith.constant 0.000000e+00 : f32
    %23 = vector.broadcast %cst_6 : f32 to vector<2x8xf32>
    %24 = tpu.concatenate %22, %23 in 1 : vector<2x136xf32>, vector<2x8xf32> -> vector<2x144xf32>
    %25 = arith.maximumf %21, %24 : vector<2x144xf32>
    %26 = vector.extract_strided_slice %25 {offsets = [0, 0], sizes = [2, 128], strides = [1, 1]} : vector<2x144xf32> to vector<2x128xf32>
    %cst_7 = arith.constant 1.000000e+00 : f32
    %27 = vector.broadcast %cst_7 : f32 to vector<2x128xf32>
    %28 = arith.subf %27, %26 : vector<2x128xf32>
    %29 = tpu.iota {dimensions = array<i32: 0>} : vector<2x1xi32>
    %c2_i32 = arith.constant 2 : i32
    %30 = arith.muli %arg0, %c2_i32 : i32
    %31 = vector.broadcast %30 : i32 to vector<2x1xi32>
    %32 = arith.addi %29, %31 : vector<2x1xi32>
    %c2_i32_8 = arith.constant 2 : i32
    %33 = vector.broadcast %c2_i32_8 : i32 to vector<2x1xi32>
    %34 = arith.cmpi slt, %32, %33 : vector<2x1xi32>
    %35 = arith.extui %34 : vector<2x1xi1> to vector<2x1xi32>
    %36 = arith.sitofp %35 : vector<2x1xi32> to vector<2x1xf32>
    %c0_9 = arith.constant 0 : index
    %c0_10 = arith.constant 0 : index
    %37 = vector.load %arg3[%c0_9, %c0_10] : memref<1x1xf32, #tpu.memory_space<vmem>>, vector<1x1xf32>
    %38 = vector.broadcast %36 : vector<2x1xf32> to vector<2x128xf32>
    %39 = arith.mulf %28, %38 : vector<2x128xf32>
    %40 = vector.shape_cast %39 : vector<2x128xf32> to vector<1x2x128xf32>
    %cst_11 = arith.constant dense<0.000000e+00> : vector<1xf32>
    %41 = vector.multi_reduction <add>, %40, %cst_11 [1, 2] : vector<1x2x128xf32> to vector<1xf32>
    %42 = vector.shape_cast %41 : vector<1xf32> to vector<1x1x1xf32>
    %43 = vector.extract %42[0, 0, 0] : f32 from vector<1x1x1xf32>
    %44 = vector.broadcast %43 : f32 to vector<1x1xf32>
    %45 = arith.addf %37, %44 : vector<1x1xf32>
    %c0_12 = arith.constant 0 : index
    %c0_13 = arith.constant 0 : index
    %46 = vector.load %arg3[%c0_12, %c0_13] : memref<1x1xf32, #tpu.memory_space<vmem>>, vector<1x1xf32>
    tpu.vector_store %arg3[%c0_12, %c0_13], %45 {strides = array<i32>} : memref<1x1xf32, #tpu.memory_space<vmem>>, vector<1x1xf32>,
    %c0_i32_14 = arith.constant 0 : i32
    %47 = arith.cmpi eq, %arg0, %c0_i32_14 : i32
    %48 = arith.extui %47 : i1 to i32
    %c0_i32_15 = arith.constant 0 : i32
    %49 = arith.cmpi ne, %48, %c0_i32_15 : i32
    scf.if %49 {
      %c0_16 = arith.constant 0 : index
      %c0_17 = arith.constant 0 : index
      %50 = vector.load %arg3[%c0_16, %c0_17] : memref<1x1xf32, #tpu.memory_space<vmem>>, vector<1x1xf32>
      %cst_18 = arith.constant 2.560000e+02 : f32
      %51 = vector.broadcast %cst_18 : f32 to vector<1x1xf32>
      %52 = arith.divf %51, %50 : vector<1x1xf32>
      %c0_19 = arith.constant 0 : index
      %c0_20 = arith.constant 0 : index
      %53 = vector.load %arg2[%c0_19, %c0_20] : memref<1x1xf32, #tpu.memory_space<vmem>>, vector<1x1xf32>
      tpu.vector_store %arg2[%c0_19, %c0_20], %52 {strides = array<i32>} : memref<1x1xf32, #tpu.memory_space<vmem>>, vector<1x1xf32>,
    } else {
    }
    return
  }
  func.func @transform_0(%arg0: i32) -> (i32, i32) {
    %c0_i32 = arith.constant 0 : i32
    %c0_i32_0 = arith.constant 0 : i32
    return %arg0, %c0_i32 : i32, i32
  }
  func.func @transform_1(%arg0: i32) -> (i32, i32) {
    %c0_i32 = arith.constant 0 : i32
    %c0_i32_0 = arith.constant 0 : i32
    %c0_i32_1 = arith.constant 0 : i32
    return %c0_i32, %c0_i32_0 : i32, i32
  }
}

</mosaic_0001>

<bundles_post_ra>
// kernel: tpu_custom_call.1
= control target key start
LH: loop header
LB: loop body
LE: loop exit
PB: predicated region body
PF: predicated region fallthrough
CT: control target
= control target key end

     0   :  { %6 = vsyncpa [#allocation4], 0  ;;  %s246_s0 = inlined_call_operand.hbm [shape: f32[2,128], index: 0, kind: input, shape index: {}]   ;;  %s247_s1 = inlined_call_operand.hbm [shape: f32[1,1], index: 1, kind: output, shape index: {}]  }
   0x1   :  { %7 = vsyncpa [#allocation5], 0  ;;  %s216_s6 = smov [#allocation3]  }
   0x2   :  { %s14_s7 = sshll.u32 %s216_s6, 4  ;;  %s15_s7 = int_to_ptr.vmem [resolvable:$true] %s14_s7 }
   0x3   :  { %s180_s8 = scalar_lea.vmem %s15_s7, 32  ;;  %p185_p1 = scmp.lt.s32.totalorder %s15_s7, %s15_s7 }
   0x4   :  { %p181_p0 = scmp.ne.s32.totalorder %s15_s7, %s180_s8  ;;  %p186_p2 = scmp.lt.s32.totalorder %s180_s8, %s180_s8 }
   0x6   :  { %p187_p3 = por %p186_p2, %p185_p1 }
   0x8   :  { %p188_p4 = pnand %p187_p3, %p181_p0 }
   0xa   :  { %191 = shalt.err (!%p188_p4)
}
   0xb   :  { %17 = dma.hbm_to_vmem [thread:$0]  %s246_s0, 32, %s15_s7, [#allocation4]  }
   0xc   :  { %212 = dma.done.wait [#allocation4], 32  }
   0xd   :  { %213 = vsyncadd [#allocation4], 4294967264  ;;  %v27_v0 = vld [vmem:[#allocation3] sm:$0x3]  ;;  %v217_v1 = vmov 0.0   ;;  %s218_s11 = smov 8   ;;  %v91_v31 = vlaneseq }
   0xe   :  { %vm28_vm0 = vcmp.lt.f32.partialorder %v27_v0, 0.000390625  ;;  %vm35_vm1 = vcmask 64512   ;;  %s219_s12 = smov 127   ;;  %vm48_vm2 = vcmask 121856   ;;  %vm44_vm3 = vcmask 1039360  }
   0xf   :  { %v138_v2 = vsel %vm28_vm0, 1.0, %v217_v1  ;;  %s220_s0 = smov 126   ;;  %vm58_vm4 = vcmask 1031168   ;;  %vm62_vm5 = vcmask 113664   ;;  %s221_s13 = smov 124   ;;  %vm72_vm6 = vcmask 1014784  }
  0x10   :  { %32 = vrot.lane.b32.xlu0 %v138_v2, %s218_s11  ;;  %vm76_vm7 = vcmask 97280   ;;  %s222_s14 = smov 120   ;;  %v92_v32 = vshrl.u32 %v91_v31, 7  ;;  %vm86_vm8 = vcmask 982016   ;;  %vm101_vm10 = vcmask 1041408   ;;  %s223_s16 = smov [#allocation6]  }
  0x11   :  { %vm25_vm11 = vcmask 0   ;;  %s129_s17 = sshll.u32 %s223_s16, 4  ;;  %s130_s17 = int_to_ptr.vmem [resolvable:$true] %s129_s17 }
  0x12   :  { %vm96_vm9 = vcmp.lt.s32.totalorder %v92_v32, 2  ;;  %26 = vst.msk [vmem:[#allocation2] sm:$0x1] %vm25_vm11, %v217_v1  ;;  %s192_s18 = scalar_lea.vmem %s130_s17, 16  ;;  %s196_s19 = scalar_lea.vmem %s130_s17, 32 }
  0x13   :  { %v139_v38 = vsel %vm96_vm9, 1.0, %v217_v1  ;;  %p193_p5 = scmp.ne.s32.totalorder %s130_s17, %s192_s18  ;;  %p197_p6 = scmp.lt.s32.totalorder %s130_s17, %s130_s17 }
  0x14   :  { %p198_p7 = scmp.lt.s32.totalorder %s196_s19, %s192_s18 }
  0x16   :  { %p199_p8 = por %p198_p7, %p197_p6 }
  0x18   :  { %p200_p9 = pnand %p199_p8, %p193_p5 }
  0x19   :  { %v99_v49 = vld [vmem:[#allocation2] sm:$0x1] }
  0x82   :  { %v33_v3 = vpop.permute.xlu0 %32 }
  0x83   :  { %v36_v4 = vsel %vm35_vm1, 0.0, %v33_v3  ;;  %v37_v5 = vsel %vm35_vm1, %v33_v3, 0.0 }
  0x84   :  { %v150_v6 = vpack.i.bf16 %v37_v5, %v36_v4 }
  0x86   :  { %151 = vrot.lane.b32.xlu0 %v150_v6, %s219_s12 }
  0xf8   :  { %v152_v7 = vpop.permute.xlu0 %151 }
  0xf9   :  { %v154_v8 = vunpack.i.h.bf16 %v152_v7  ;;  %v153_v9 = vunpack.i.l.bf16 %v152_v7 }
  0xfb   :  { %v49_v10 = vsel %vm48_vm2, %v154_v8, 0.0  ;;  %v45_v11 = vsel %vm44_vm3, %v153_v9, %v154_v8 }
  0xfc   :  { %v50_v12 = vmax.f32 %v36_v4, %v45_v11  ;;  %v51_v13 = vmax.f32 %v37_v5, %v49_v10 }
  0xfe   :  { %v155_v14 = vpack.i.bf16 %v51_v13, %v50_v12 }
 0x100   :  { %156 = vrot.lane.b32.xlu1 %v155_v14, %s220_s0 }
 0x172   :  { %v157_v15 = vpop.permute.xlu1 %156 }
 0x173   :  { %v159_v16 = vunpack.i.h.bf16 %v157_v15  ;;  %v158_v17 = vunpack.i.l.bf16 %v157_v15 }
 0x175   :  { %v63_v18 = vsel %vm62_vm5, %v159_v16, 0.0  ;;  %v59_v19 = vsel %vm58_vm4, %v158_v17, %v159_v16 }
 0x176   :  { %v65_v20 = vmax.f32 %v51_v13, %v63_v18  ;;  %v64_v21 = vmax.f32 %v50_v12, %v59_v19 }
 0x178   :  { %v160_v22 = vpack.i.bf16 %v65_v20, %v64_v21 }
 0x17a   :  { %161 = vrot.lane.b32.xlu1 %v160_v22, %s221_s13 }
 0x1ec   :  { %v162_v23 = vpop.permute.xlu1 %161 }
 0x1ed   :  { %v164_v24 = vunpack.i.h.bf16 %v162_v23  ;;  %v163_v25 = vunpack.i.l.bf16 %v162_v23 }
 0x1ef   :  { %v77_v26 = vsel %vm76_vm7, %v164_v24, 0.0  ;;  %v73_v27 = vsel %vm72_vm6, %v163_v25, %v164_v24 }
 0x1f0   :  { %v79_v28 = vmax.f32 %v65_v20, %v77_v26  ;;  %v78_v29 = vmax.f32 %v64_v21, %v73_v27 }
 0x1f2   :  { %v165_v30 = vpack.i.bf16 %v79_v28, %v78_v29 }
 0x1f4   :  { %166 = vrot.lane.b32.xlu0 %v165_v30, %s222_s14 }
 0x266   :  { %v167_v33 = vpop.permute.xlu0 %166 }
 0x267   :  { %v169_v34 = vunpack.i.h.bf16 %v167_v33  ;;  %v168_v35 = vunpack.i.l.bf16 %v167_v33 }
 0x269   :  { %v87_v36 = vsel %vm86_vm8, %v168_v35, %v169_v34 }
 0x26a   :  { %v89_v37 = vmax.f32 %v78_v29, %v87_v36 }
 0x26c   :  { %v90_v39 = vsub.f32 1.0, %v89_v37 }
 0x26e   :  { %v100_v40 = vmul.f32 %v139_v38, %v90_v39 }
 0x270   :  { %v102_v41 = vsel %vm101_vm10, %v100_v40, 0.0 }
 0x271   :  { %103 = vadd.xlane.f32.xlu1 %v102_v41 }
 0x2fa   :  { %v104_v42 = vpop.xlane.xlu1 %103 }
 0x2fb   :  { %v105_v43 = vrot.slane %v104_v42, 4 }
 0x2fd   :  { %v106_v44 = vadd.f32 %v105_v43, %v104_v42 }
 0x2ff   :  { %v107_v45 = vrot.slane %v106_v44, 2 }
 0x301   :  { %v108_v46 = vadd.f32 %v107_v45, %v106_v44 }
 0x303   :  { %v109_v47 = vrot.slane %v108_v46, 1 }
 0x305   :  { %v110_v48 = vadd.f32 %v109_v47, %v108_v46 }
 0x307   :  { %140 = vpush %v110_v48 }
 0x338   :  { %s141_s15 = spop %140 }
 0x339   :  { %v112_v50 = vstv %s141_s15 }
 0x33a   :  { %v113_v51 = vadd.f32 %v112_v50, %v99_v49 }
 0x33c   :  { %115 = vst.msk [vmem:[#allocation2] sm:$0x1] %vm25_vm11, %v113_v51 }
 0x343   :  { %v119_v52 = vld [vmem:[#allocation2] sm:$0x1] }
 0x344   :  { %170 = vrcp.f32 %v119_v52 }
 0x351   :  { %v171_v53 = vpop.eup %170 }
 0x352   :  { %v121_v54 = vmul.f32 256.0, %v171_v53 }
 0x354   :  { %122 = vst.msk [vmem:[#allocation6] sm:$0x1] %vm25_vm11, %v121_v54 }
 0x355   :  { %203 = shalt.err (!%p200_p9)
}
 0x356   :  { %132 = dma.vmem_to_hbm [thread:$0]  %s130_s17, 16, %s247_s1, [#allocation5]  }
 0x357   :  { %214 = dma.done.wait [#allocation5], 16  }
 0x358   :  { %215 = vsyncadd [#allocation5], 4294967280 }
 0x359   :  { %136 = vsyncpa [#allocation4], 1 }
 0x35a   :  { %137 = vsyncpa [#allocation5], 1 }

</bundles_post_ra>
